<compile_context>
chip_gen: v6e
topology: v6e:2x2x1
jax: 0.10.0
libtpu: 0.0.40
codegen_flags: <defaults>
</compile_context>

<pallas_src>
import functools

import jax
import jax.numpy as jnp
from jax.experimental import pallas as pl
from jax.experimental.pallas import tpu as pltpu

KSIZE = 3
PAD = 1  # padding = 1 for kernel_size = 3 (as in the PyTorch module)


def _sa_kernel(w_ref, x_ref, o_ref, *, H, W, red_chunk):
    """One grid step: a block of `nb` batch elements, full (C, H*W) each.

    w_ref: SMEM (2*9,) f32   flattened conv weights [in_ch, kh, kw];
                             channel-0 (avg) taps pre-scaled by 1/C.
    x_ref: VMEM (nb, C, HW)  input block (native dtype).
    o_ref: VMEM (nb, C, HW)  output block.
    """
    HW = H * W
    nb, C, _ = x_ref.shape

    # ---- channel reduction: streamed from the ref in sublane-sized chunks ----
    # Sum accumulates in f32 (the mean's 1/C is folded into the conv weights);
    # max stays in the native dtype.  axis-1 reductions use the XLU.
    cs0 = min(red_chunk, C)
    chunk = x_ref[:, 0:cs0, :]
    ch_sum = jnp.sum(chunk.astype(jnp.float32), axis=1)          # (nb, HW) f32
    ch_max = jnp.max(chunk, axis=1)                              # (nb, HW) native
    c = cs0
    while c < C:
        cs = min(red_chunk, C - c)
        chunk = x_ref[:, c:c + cs, :]
        ch_sum = ch_sum + jnp.sum(chunk.astype(jnp.float32), axis=1)
        ch_max = jnp.maximum(ch_max, jnp.max(chunk, axis=1))
        c += cs
    f_avg = ch_sum                         # 1/C already folded into ch-0 taps
    f_max = ch_max.astype(jnp.float32)

    # ---- boundary masks, built once from an in-kernel iota -------------------
    pos = jax.lax.broadcasted_iota(jnp.int32, (nb, HW), 1)       # p = i*W + j
    col = (pos & (W - 1)) if (W & (W - 1)) == 0 else pos - (pos // W) * W
    row_ok = (pos >= W, None, pos < (H - 1) * W)                 # dy = -1, 0, +1
    col_ok = (col != 0, None, col != W - 1)                      # dx = -1, 0, +1

    # ---- 3x3 cross-correlation: lane rolls, one shared mask/select per tap ---
    acc = jnp.zeros((nb, HW), jnp.float32)
    for ky in range(KSIZE):
        for kx in range(KSIZE):
            shift = (ky - PAD) * W + (kx - PAD)
            if shift == 0:
                r_avg, r_max = f_avg, f_max
            else:
                # tap[p] = f[(p + shift) mod HW]; wrapped lanes are masked off.
                amt = (-shift) % HW
                r_avg = pltpu.roll(f_avg, shift=amt, axis=1)
                r_max = pltpu.roll(f_max, shift=amt, axis=1)
            w_avg = w_ref[0 * KSIZE * KSIZE + ky * KSIZE + kx]   # SMEM scalars
            w_max = w_ref[1 * KSIZE * KSIZE + ky * KSIZE + kx]
            s = w_avg * r_avg + w_max * r_max                    # (nb, HW)
            mask = row_ok[ky]
            if col_ok[kx] is not None:
                mask = col_ok[kx] if mask is None else jnp.logical_and(mask, col_ok[kx])
            if mask is not None:
                s = jnp.where(mask, s, 0.0)                      # single shared select
            acc = acc + s

    # ---- sigmoid gate on the EUP, modulate by streaming x per channel --------
    attn = pl.reciprocal(1.0 + jnp.exp(-acc), approx=True)      # (nb, HW) f32
    for ci in range(C):
        xc = x_ref[:, ci, :].astype(jnp.float32)
        o_ref[:, ci, :] = (attn * xc).astype(o_ref.dtype)


def _num_tensorcores():
    """TensorCores a single pallas_call can shard a 'parallel' grid axis over."""
    try:
        kind = jax.devices()[0].device_kind.lower()
    except Exception:  # pragma: no cover - defensive only
        return 1
    # Single-TC chips: v2/v3 per-core devices, v5e ("v5 lite"), v6e.
    if any(t in kind for t in ("lite", "v5e", "v6e", "v2", "v3")):
        return 1
    return 2  # v4 / v5p megacore, v7x dual TensorCore


def _pick_batch_block(n, bytes_per_image, hw_f32_bytes, num_tc,
                      target_block_bytes=4 << 20, conv_temp_bytes=512 << 10):
    """Batch-block size: big blocks for DMA efficiency (x-block up to ~4 MiB,
    plus a cap on nb*HW so the ~10 live f32/int conv maps stay comfortably in
    VMEM), while giving every TensorCore a few grid steps so the pipeline has
    a steady state — and without forcing extra steps on single-TC chips."""
    cap = max(1, int(target_block_bytes) // max(int(bytes_per_image), 1))
    cap = min(cap, max(1, int(conv_temp_bytes) // max(int(hw_f32_bytes), 1)))
    if num_tc > 1:
        steps = 3 * num_tc                       # a few steps per core
        if n >= steps:
            cap = min(cap, max(1, n // steps))
        elif n >= num_tc:
            cap = min(cap, max(1, n // num_tc))
    cap = max(1, min(cap, n))
    # Prefer an exact divisor close to the cap (no padded tail) ...
    for nb in range(cap, 0, -1):
        if n % nb == 0 and nb * 2 > cap:
            return nb
    return cap  # ... otherwise the caller pads N up to a multiple of `cap`.


def spatial_attention(x, weight):
    """x: (N, C, H, W); weight: (1, 2, 3, 3) from nn.Conv2d(2, 1, 3, padding=1, bias=False)."""
    N, C, H, W = x.shape
    HW = H * W
    itemsize = jnp.dtype(x.dtype).itemsize

    # Free row-major reshape -> lane-dense trailing dim (HW): dense loads and
    # unmasked output stores instead of W-wide partial stores.
    x3 = x.reshape(N, C, HW)

    # Flatten conv weights; fold the 1/C of the channel mean into the
    # channel-0 (avg-map) taps so the kernel only needs a channel *sum*.
    w = weight.astype(jnp.float32).reshape(2, KSIZE * KSIZE)
    w = w.at[0].multiply(1.0 / C)
    w_flat = w.reshape(-1)

    num_tc = _num_tensorcores()
    nb = _pick_batch_block(N, C * HW * itemsize, HW * 4, num_tc)
    pad = (-N) % nb
    if pad:
        x3 = jnp.pad(x3, ((0, pad), (0, 0), (0, 0)))
    n_padded = N + pad
    grid = (n_padded // nb,)

    # Channel-chunk size for the in-kernel sublane reductions (8 f32 / 16 bf16).
    red_chunk = max(1, 32 // itemsize)

    # Advisory cost: HBM-bound on v5e/v6e, closer to VPU-bound on v7x; either
    # way the 18-deep conv stays on VPU+XLU (never im2col'd onto the MXU).
    cost = pl.CostEstimate(
        flops=int(N * HW * (3 * C + 4 * KSIZE * KSIZE + 6)),
        transcendentals=int(2 * N * HW),
        bytes_accessed=int(2 * N * C * HW * itemsize),
    )

    # TODO(synk): for C far below the sublane pack (8 f32 / 16 bf16), fold a
    # group of batch images into the sublane axis to avoid half-empty tiles on
    # the x block (irrelevant when C is already a multiple of the pack).
    out = pl.pallas_call(
        functools.partial(_sa_kernel, H=H, W=W, red_chunk=red_chunk),
        out_shape=jax.ShapeDtypeStruct((n_padded, C, HW), x.dtype),
        grid=grid,
        in_specs=[
            pl.BlockSpec(memory_space=pltpu.MemorySpace.SMEM),   # conv weights (scalars)
            pl.BlockSpec((nb, C, HW), lambda n: (n, 0, 0)),      # x block
        ],
        out_specs=pl.BlockSpec((nb, C, HW), lambda n: (n, 0, 0)),
        compiler_params=pltpu.CompilerParams(
            dimension_semantics=("parallel",),
            vmem_limit_bytes=32 << 20,
        ),
        cost_estimate=cost,
    )(w_flat, x3)
    if pad:
        out = out[:N]
    return out.reshape(N, C, H, W)


def reference(x, weight):
    """Pure-JAX reference matching the PyTorch forward."""
    avg = jnp.mean(x, axis=1, keepdims=True)
    mx = jnp.max(x, axis=1, keepdims=True)
    y = jnp.concatenate([avg, mx], axis=1)
    y = jax.lax.conv_general_dilated(
        y, weight, window_strides=(1, 1), padding=[(PAD, PAD), (PAD, PAD)],
        dimension_numbers=("NCHW", "OIHW", "NCHW"))
    return jax.nn.sigmoid(y) * x


if __name__ == "__main__":
    key = jax.random.PRNGKey(0)
    kx, kw = jax.random.split(key)

    N, C, H, W = 2, 4, 16, 16
    x = jax.random.normal(kx, (N, C, H, W), dtype=jnp.float32)
    # Deterministic synthetic conv weight (shape of nn.Conv2d(2, 1, 3, padding=1, bias=False)).
    weight = jax.random.normal(kw, (1, 2, KSIZE, KSIZE), dtype=jnp.float32) * 0.1

    out = jax.block_until_ready(spatial_attention(x, weight))
    ref = reference(x, weight)

    assert out.shape == (N, C, H, W)
    # Gate uses the EUP approximate reciprocal (pl.reciprocal(approx=True)),
    # so allow ~1e-3 slack vs the exact sigmoid reference.
    assert jnp.allclose(out, ref, atol=2e-3, rtol=2e-3), "mismatch vs. JAX reference"

    print("KERNEL_OK")
</pallas_src>

<mosaic_0001>
module attributes {stable_mosaic.version = 11 : i64} {
  func.func @_sa_kernel(%arg0: i32, %arg1: memref<18xf32, #tpu.memory_space<smem>>, %arg2: memref<1x4x256xf32, #tpu.memory_space<vmem>>, %arg3: memref<1x4x256xf32, #tpu.memory_space<vmem>>) attributes {dimension_semantics = [#tpu.dimension_semantics<parallel>], iteration_bounds = array<i64: 2>, scalar_prefetch = 0 : i64, scratch_operands = 0 : i64, tpu.core_type = #tpu.core_type<tc>, window_params = [{transform_indices = @transform_0, window_bounds = array<i64: 18>}, {transform_indices = @transform_1, window_bounds = array<i64: 1, 4, 256>}, {transform_indices = @transform_2, window_bounds = array<i64: 1, 4, 256>}]} {
    %c0 = arith.constant 0 : index
    %c0_0 = arith.constant 0 : index
    %c0_1 = arith.constant 0 : index
    %0 = vector.load %arg2[%c0, %c0_0, %c0_1] : memref<1x4x256xf32, #tpu.memory_space<vmem>>, vector<1x4x256xf32>
    %cst = arith.constant dense<0.000000e+00> : vector<1x256xf32>
    %1 = vector.multi_reduction <add>, %0, %cst [1] : vector<1x4x256xf32> to vector<1x256xf32>
    %cst_2 = arith.constant dense<0xFF800000> : vector<1x256xf32>
    %2 = vector.multi_reduction <maximumf>, %0, %cst_2 [1] : vector<1x4x256xf32> to vector<1x256xf32>
    %3 = tpu.iota {dimensions = array<i32: 1>} : vector<1x256xi32>
    %c15_i32 = arith.constant 15 : i32
    %4 = vector.broadcast %c15_i32 : i32 to vector<1x256xi32>
    %5 = arith.andi %3, %4 : vector<1x256xi32>
    %c16_i32 = arith.constant 16 : i32
    %6 = vector.broadcast %c16_i32 : i32 to vector<1x256xi32>
    %7 = arith.cmpi sge, %3, %6 : vector<1x256xi32>
    %c240_i32 = arith.constant 240 : i32
    %8 = vector.broadcast %c240_i32 : i32 to vector<1x256xi32>
    %9 = arith.cmpi slt, %3, %8 : vector<1x256xi32>
    %c0_i32 = arith.constant 0 : i32
    %10 = vector.broadcast %c0_i32 : i32 to vector<1x256xi32>
    %11 = arith.cmpi ne, %5, %10 : vector<1x256xi32>
    %c15_i32_3 = arith.constant 15 : i32
    %12 = vector.broadcast %c15_i32_3 : i32 to vector<1x256xi32>
    %13 = arith.cmpi ne, %5, %12 : vector<1x256xi32>
    %cst_4 = arith.constant 0.000000e+00 : f32
    %14 = vector.broadcast %cst_4 : f32 to vector<1x256xf32>
    %c17_i32 = arith.constant 17 : i32
    %15 = tpu.dynamic_rotate %1 by %c17_i32 dim 1 : vector<1x256xf32>, i32 -> vector<1x256xf32>
    %c17_i32_5 = arith.constant 17 : i32
    %16 = tpu.dynamic_rotate %2 by %c17_i32_5 dim 1 : vector<1x256xf32>, i32 -> vector<1x256xf32>
    %c0_6 = arith.constant 0 : index
    %17 = memref.load %arg1[%c0_6] : memref<18xf32, #tpu.memory_space<smem>>
    %c9 = arith.constant 9 : index
    %18 = memref.load %arg1[%c9] : memref<18xf32, #tpu.memory_space<smem>>
    %19 = vector.broadcast %17 : f32 to vector<1x256xf32>
    %20 = arith.mulf %19, %15 : vector<1x256xf32>
    %21 = vector.broadcast %18 : f32 to vector<1x256xf32>
    %22 = arith.mulf %21, %16 : vector<1x256xf32>
    %23 = arith.addf %20, %22 : vector<1x256xf32>
    %24 = arith.andi %7, %11 : vector<1x256xi1>
    %cst_7 = arith.constant 0.000000e+00 : f32
    %25 = vector.broadcast %cst_7 : f32 to vector<1x256xf32>
    %26 = arith.select %24, %23, %25 : vector<1x256xi1>, vector<1x256xf32>
    %27 = arith.addf %14, %26 : vector<1x256xf32>
    %c16_i32_8 = arith.constant 16 : i32
    %28 = tpu.dynamic_rotate %1 by %c16_i32_8 dim 1 : vector<1x256xf32>, i32 -> vector<1x256xf32>
    %c16_i32_9 = arith.constant 16 : i32
    %29 = tpu.dynamic_rotate %2 by %c16_i32_9 dim 1 : vector<1x256xf32>, i32 -> vector<1x256xf32>
    %c1 = arith.constant 1 : index
    %30 = memref.load %arg1[%c1] : memref<18xf32, #tpu.memory_space<smem>>
    %c10 = arith.constant 10 : index
    %31 = memref.load %arg1[%c10] : memref<18xf32, #tpu.memory_space<smem>>
    %32 = vector.broadcast %30 : f32 to vector<1x256xf32>
    %33 = arith.mulf %32, %28 : vector<1x256xf32>
    %34 = vector.broadcast %31 : f32 to vector<1x256xf32>
    %35 = arith.mulf %34, %29 : vector<1x256xf32>
    %36 = arith.addf %33, %35 : vector<1x256xf32>
    %cst_10 = arith.constant 0.000000e+00 : f32
    %37 = vector.broadcast %cst_10 : f32 to vector<1x256xf32>
    %38 = arith.select %7, %36, %37 : vector<1x256xi1>, vector<1x256xf32>
    %39 = arith.addf %27, %38 : vector<1x256xf32>
    %c15_i32_11 = arith.constant 15 : i32
    %40 = tpu.dynamic_rotate %1 by %c15_i32_11 dim 1 : vector<1x256xf32>, i32 -> vector<1x256xf32>
    %c15_i32_12 = arith.constant 15 : i32
    %41 = tpu.dynamic_rotate %2 by %c15_i32_12 dim 1 : vector<1x256xf32>, i32 -> vector<1x256xf32>
    %c2 = arith.constant 2 : index
    %42 = memref.load %arg1[%c2] : memref<18xf32, #tpu.memory_space<smem>>
    %c11 = arith.constant 11 : index
    %43 = memref.load %arg1[%c11] : memref<18xf32, #tpu.memory_space<smem>>
    %44 = vector.broadcast %42 : f32 to vector<1x256xf32>
    %45 = arith.mulf %44, %40 : vector<1x256xf32>
    %46 = vector.broadcast %43 : f32 to vector<1x256xf32>
    %47 = arith.mulf %46, %41 : vector<1x256xf32>
    %48 = arith.addf %45, %47 : vector<1x256xf32>
    %49 = arith.andi %7, %13 : vector<1x256xi1>
    %cst_13 = arith.constant 0.000000e+00 : f32
    %50 = vector.broadcast %cst_13 : f32 to vector<1x256xf32>
    %51 = arith.select %49, %48, %50 : vector<1x256xi1>, vector<1x256xf32>
    %52 = arith.addf %39, %51 : vector<1x256xf32>
    %c1_i32 = arith.constant 1 : i32
    %53 = tpu.dynamic_rotate %1 by %c1_i32 dim 1 : vector<1x256xf32>, i32 -> vector<1x256xf32>
    %c1_i32_14 = arith.constant 1 : i32
    %54 = tpu.dynamic_rotate %2 by %c1_i32_14 dim 1 : vector<1x256xf32>, i32 -> vector<1x256xf32>
    %c3 = arith.constant 3 : index
    %55 = memref.load %arg1[%c3] : memref<18xf32, #tpu.memory_space<smem>>
    %c12 = arith.constant 12 : index
    %56 = memref.load %arg1[%c12] : memref<18xf32, #tpu.memory_space<smem>>
    %57 = vector.broadcast %55 : f32 to vector<1x256xf32>
    %58 = arith.mulf %57, %53 : vector<1x256xf32>
    %59 = vector.broadcast %56 : f32 to vector<1x256xf32>
    %60 = arith.mulf %59, %54 : vector<1x256xf32>
    %61 = arith.addf %58, %60 : vector<1x256xf32>
    %cst_15 = arith.constant 0.000000e+00 : f32
    %62 = vector.broadcast %cst_15 : f32 to vector<1x256xf32>
    %63 = arith.select %11, %61, %62 : vector<1x256xi1>, vector<1x256xf32>
    %64 = arith.addf %52, %63 : vector<1x256xf32>
    %c4 = arith.constant 4 : index
    %65 = memref.load %arg1[%c4] : memref<18xf32, #tpu.memory_space<smem>>
    %c13 = arith.constant 13 : index
    %66 = memref.load %arg1[%c13] : memref<18xf32, #tpu.memory_space<smem>>
    %67 = vector.broadcast %65 : f32 to vector<1x256xf32>
    %68 = arith.mulf %67, %1 : vector<1x256xf32>
    %69 = vector.broadcast %66 : f32 to vector<1x256xf32>
    %70 = arith.mulf %69, %2 : vector<1x256xf32>
    %71 = arith.addf %68, %70 : vector<1x256xf32>
    %72 = arith.addf %64, %71 : vector<1x256xf32>
    %c255_i32 = arith.constant 255 : i32
    %73 = tpu.dynamic_rotate %1 by %c255_i32 dim 1 : vector<1x256xf32>, i32 -> vector<1x256xf32>
    %c255_i32_16 = arith.constant 255 : i32
    %74 = tpu.dynamic_rotate %2 by %c255_i32_16 dim 1 : vector<1x256xf32>, i32 -> vector<1x256xf32>
    %c5 = arith.constant 5 : index
    %75 = memref.load %arg1[%c5] : memref<18xf32, #tpu.memory_space<smem>>
    %c14 = arith.constant 14 : index
    %76 = memref.load %arg1[%c14] : memref<18xf32, #tpu.memory_space<smem>>
    %77 = vector.broadcast %75 : f32 to vector<1x256xf32>
    %78 = arith.mulf %77, %73 : vector<1x256xf32>
    %79 = vector.broadcast %76 : f32 to vector<1x256xf32>
    %80 = arith.mulf %79, %74 : vector<1x256xf32>
    %81 = arith.addf %78, %80 : vector<1x256xf32>
    %cst_17 = arith.constant 0.000000e+00 : f32
    %82 = vector.broadcast %cst_17 : f32 to vector<1x256xf32>
    %83 = arith.select %13, %81, %82 : vector<1x256xi1>, vector<1x256xf32>
    %84 = arith.addf %72, %83 : vector<1x256xf32>
    %c241_i32 = arith.constant 241 : i32
    %85 = tpu.dynamic_rotate %1 by %c241_i32 dim 1 : vector<1x256xf32>, i32 -> vector<1x256xf32>
    %c241_i32_18 = arith.constant 241 : i32
    %86 = tpu.dynamic_rotate %2 by %c241_i32_18 dim 1 : vector<1x256xf32>, i32 -> vector<1x256xf32>
    %c6 = arith.constant 6 : index
    %87 = memref.load %arg1[%c6] : memref<18xf32, #tpu.memory_space<smem>>
    %c15 = arith.constant 15 : index
    %88 = memref.load %arg1[%c15] : memref<18xf32, #tpu.memory_space<smem>>
    %89 = vector.broadcast %87 : f32 to vector<1x256xf32>
    %90 = arith.mulf %89, %85 : vector<1x256xf32>
    %91 = vector.broadcast %88 : f32 to vector<1x256xf32>
    %92 = arith.mulf %91, %86 : vector<1x256xf32>
    %93 = arith.addf %90, %92 : vector<1x256xf32>
    %94 = arith.andi %9, %11 : vector<1x256xi1>
    %cst_19 = arith.constant 0.000000e+00 : f32
    %95 = vector.broadcast %cst_19 : f32 to vector<1x256xf32>
    %96 = arith.select %94, %93, %95 : vector<1x256xi1>, vector<1x256xf32>
    %97 = arith.addf %84, %96 : vector<1x256xf32>
    %c240_i32_20 = arith.constant 240 : i32
    %98 = tpu.dynamic_rotate %1 by %c240_i32_20 dim 1 : vector<1x256xf32>, i32 -> vector<1x256xf32>
    %c240_i32_21 = arith.constant 240 : i32
    %99 = tpu.dynamic_rotate %2 by %c240_i32_21 dim 1 : vector<1x256xf32>, i32 -> vector<1x256xf32>
    %c7 = arith.constant 7 : index
    %100 = memref.load %arg1[%c7] : memref<18xf32, #tpu.memory_space<smem>>
    %c16 = arith.constant 16 : index
    %101 = memref.load %arg1[%c16] : memref<18xf32, #tpu.memory_space<smem>>
    %102 = vector.broadcast %100 : f32 to vector<1x256xf32>
    %103 = arith.mulf %102, %98 : vector<1x256xf32>
    %104 = vector.broadcast %101 : f32 to vector<1x256xf32>
    %105 = arith.mulf %104, %99 : vector<1x256xf32>
    %106 = arith.addf %103, %105 : vector<1x256xf32>
    %cst_22 = arith.constant 0.000000e+00 : f32
    %107 = vector.broadcast %cst_22 : f32 to vector<1x256xf32>
    %108 = arith.select %9, %106, %107 : vector<1x256xi1>, vector<1x256xf32>
    %109 = arith.addf %97, %108 : vector<1x256xf32>
    %c239_i32 = arith.constant 239 : i32
    %110 = tpu.dynamic_rotate %1 by %c239_i32 dim 1 : vector<1x256xf32>, i32 -> vector<1x256xf32>
    %c239_i32_23 = arith.constant 239 : i32
    %111 = tpu.dynamic_rotate %2 by %c239_i32_23 dim 1 : vector<1x256xf32>, i32 -> vector<1x256xf32>
    %c8 = arith.constant 8 : index
    %112 = memref.load %arg1[%c8] : memref<18xf32, #tpu.memory_space<smem>>
    %c17 = arith.constant 17 : index
    %113 = memref.load %arg1[%c17] : memref<18xf32, #tpu.memory_space<smem>>
    %114 = vector.broadcast %112 : f32 to vector<1x256xf32>
    %115 = arith.mulf %114, %110 : vector<1x256xf32>
    %116 = vector.broadcast %113 : f32 to vector<1x256xf32>
    %117 = arith.mulf %116, %111 : vector<1x256xf32>
    %118 = arith.addf %115, %117 : vector<1x256xf32>
    %119 = arith.andi %9, %13 : vector<1x256xi1>
    %cst_24 = arith.constant 0.000000e+00 : f32
    %120 = vector.broadcast %cst_24 : f32 to vector<1x256xf32>
    %121 = arith.select %119, %118, %120 : vector<1x256xi1>, vector<1x256xf32>
    %122 = arith.addf %109, %121 : vector<1x256xf32>
    %cst_25 = arith.constant 0.000000e+00 : f32
    %123 = vector.broadcast %cst_25 : f32 to vector<1x256xf32>
    %124 = arith.subf %123, %122 : vector<1x256xf32>
    %125 = math.exp %124 : vector<1x256xf32>
    %cst_26 = arith.constant 1.000000e+00 : f32
    %126 = vector.broadcast %cst_26 : f32 to vector<1x256xf32>
    %127 = arith.addf %126, %125 : vector<1x256xf32>
    %128 = tpu.reciprocal %127 {approx = true} : vector<1x256xf32> -> vector<1x256xf32>
    %c0_27 = arith.constant 0 : index
    %c0_28 = arith.constant 0 : index
    %c0_29 = arith.constant 0 : index
    %129 = vector.load %arg2[%c0_27, %c0_28, %c0_29] : memref<1x4x256xf32, #tpu.memory_space<vmem>>, vector<1x1x256xf32>
    %130 = vector.shape_cast %129 : vector<1x1x256xf32> to vector<1x256xf32>
    %131 = arith.mulf %128, %130 : vector<1x256xf32>
    %c0_30 = arith.constant 0 : index
    %c0_31 = arith.constant 0 : index
    %c0_32 = arith.constant 0 : index
    %132 = vector.load %arg3[%c0_30, %c0_31, %c0_32] : memref<1x4x256xf32, #tpu.memory_space<vmem>>, vector<1x1x256xf32>
    %133 = vector.shape_cast %132 : vector<1x1x256xf32> to vector<1x256xf32>
    %134 = vector.shape_cast %131 : vector<1x256xf32> to vector<1x1x256xf32>
    tpu.vector_store %arg3[%c0_30, %c0_31, %c0_32], %134 {strides = array<i32>} : memref<1x4x256xf32, #tpu.memory_space<vmem>>, vector<1x1x256xf32>,
    %c0_33 = arith.constant 0 : index
    %c1_34 = arith.constant 1 : index
    %c0_35 = arith.constant 0 : index
    %135 = vector.load %arg2[%c0_33, %c1_34, %c0_35] : memref<1x4x256xf32, #tpu.memory_space<vmem>>, vector<1x1x256xf32>
    %136 = vector.shape_cast %135 : vector<1x1x256xf32> to vector<1x256xf32>
    %137 = arith.mulf %128, %136 : vector<1x256xf32>
    %c0_36 = arith.constant 0 : index
    %c1_37 = arith.constant 1 : index
    %c0_38 = arith.constant 0 : index
    %138 = vector.load %arg3[%c0_36, %c1_37, %c0_38] : memref<1x4x256xf32, #tpu.memory_space<vmem>>, vector<1x1x256xf32>
    %139 = vector.shape_cast %138 : vector<1x1x256xf32> to vector<1x256xf32>
    %140 = vector.shape_cast %137 : vector<1x256xf32> to vector<1x1x256xf32>
    tpu.vector_store %arg3[%c0_36, %c1_37, %c0_38], %140 {strides = array<i32>} : memref<1x4x256xf32, #tpu.memory_space<vmem>>, vector<1x1x256xf32>,
    %c0_39 = arith.constant 0 : index
    %c2_40 = arith.constant 2 : index
    %c0_41 = arith.constant 0 : index
    %141 = vector.load %arg2[%c0_39, %c2_40, %c0_41] : memref<1x4x256xf32, #tpu.memory_space<vmem>>, vector<1x1x256xf32>
    %142 = vector.shape_cast %141 : vector<1x1x256xf32> to vector<1x256xf32>
    %143 = arith.mulf %128, %142 : vector<1x256xf32>
    %c0_42 = arith.constant 0 : index
    %c2_43 = arith.constant 2 : index
    %c0_44 = arith.constant 0 : index
    %144 = vector.load %arg3[%c0_42, %c2_43, %c0_44] : memref<1x4x256xf32, #tpu.memory_space<vmem>>, vector<1x1x256xf32>
    %145 = vector.shape_cast %144 : vector<1x1x256xf32> to vector<1x256xf32>
    %146 = vector.shape_cast %143 : vector<1x256xf32> to vector<1x1x256xf32>
    tpu.vector_store %arg3[%c0_42, %c2_43, %c0_44], %146 {strides = array<i32>} : memref<1x4x256xf32, #tpu.memory_space<vmem>>, vector<1x1x256xf32>,
    %c0_45 = arith.constant 0 : index
    %c3_46 = arith.constant 3 : index
    %c0_47 = arith.constant 0 : index
    %147 = vector.load %arg2[%c0_45, %c3_46, %c0_47] : memref<1x4x256xf32, #tpu.memory_space<vmem>>, vector<1x1x256xf32>
    %148 = vector.shape_cast %147 : vector<1x1x256xf32> to vector<1x256xf32>
    %149 = arith.mulf %128, %148 : vector<1x256xf32>
    %c0_48 = arith.constant 0 : index
    %c3_49 = arith.constant 3 : index
    %c0_50 = arith.constant 0 : index
    %150 = vector.load %arg3[%c0_48, %c3_49, %c0_50] : memref<1x4x256xf32, #tpu.memory_space<vmem>>, vector<1x1x256xf32>
    %151 = vector.shape_cast %150 : vector<1x1x256xf32> to vector<1x256xf32>
    %152 = vector.shape_cast %149 : vector<1x256xf32> to vector<1x1x256xf32>
    tpu.vector_store %arg3[%c0_48, %c3_49, %c0_50], %152 {strides = array<i32>} : memref<1x4x256xf32, #tpu.memory_space<vmem>>, vector<1x1x256xf32>,
    return
  }
  func.func @transform_0(%arg0: i32) -> i32 {
    %c0_i32 = arith.constant 0 : i32
    %c0_i32_0 = arith.constant 0 : i32
    return %c0_i32 : i32
  }
  func.func @transform_1(%arg0: i32) -> (i32, i32, i32) {
    %c0_i32 = arith.constant 0 : i32
    %c0_i32_0 = arith.constant 0 : i32
    %c0_i32_1 = arith.constant 0 : i32
    return %arg0, %c0_i32, %c0_i32_0 : i32, i32, i32
  }
  func.func @transform_2(%arg0: i32) -> (i32, i32, i32) {
    %c0_i32 = arith.constant 0 : i32
    %c0_i32_0 = arith.constant 0 : i32
    %c0_i32_1 = arith.constant 0 : i32
    return %arg0, %c0_i32, %c0_i32_0 : i32, i32, i32
  }
}

</mosaic_0001>

<bundles_post_ra>
// kernel: tpu_custom_call.1
= control target key start
LH: loop header
LB: loop body
LE: loop exit
PB: predicated region body
PF: predicated region fallthrough
CT: control target
= control target key end

     0   :  { %7 = vsyncpa [#allocation5], 0  ;;  %s1368_s0 = inlined_call_operand.hbm [shape: f32[18], index: 0, kind: input, shape index: {}]   ;;  %s1369_s1 = inlined_call_operand.hbm [shape: f32[2,4,256], index: 1, kind: input, shape index: {}]   ;;  %s1370_s2 = inlined_call_operand.hbm [shape: f32[2,4,256], index: 2, kind: output, shape index: {}]  }
   0x1   :  { %8 = vsyncpa [#allocation3], 0 }
   0x2   :  { %10 = vsyncpa [#allocation3 + $0x1], 0 }
   0x3   :  { %11 = vsyncpa [#allocation4], 0 }
   0x4   :  { %13 = vsyncpa [#allocation4 + $0x1], 0  ;;  %s955_s9 = smov 0   ;;  %s957_s10 = smov 0  }
   0x5   :  { %s959_s11 = smov 0   ;;  %s961_s12 = smov 0  }
   0x6 LB: > { %s976_s13 = sadd.s32 4294967295, %s926_s12   ;;  %s703_s14 = sadd.s32 4294967294, %s926_s12   ;;  %s926_s12 = sphi %s961_s12, %s1404_s12   ;;  %s922_s11 = sphi %s959_s11, %s1403_s11   ;;  %s918_s10 = sphi %s957_s10, %s1402_s10   ;;  %s914_s9 = sphi %s955_s9, %s1401_s9  }
   0x7   : > { %p60_p0 = scmp.ne.s32.totalorder %s918_s10, %s914_s9  ;;  %p1371_p1 = scmp.eq.s32.totalorder %s976_s13, 0 }
   0x8   : > { %p84_p2 = scmp.eq.s32.totalorder %s976_s13, 1  ;;  %p90_p3 = scmp.eq.s32.totalorder %s703_s14, 1 }
   0x9   : > { %p985_p4 = por %p1371_p1, %p60_p0  ;;  %p704_p5 = scmp.ge.s32.totalorder %s926_s12, 1 }
   0xa   : > { %p990_p6 = por %p90_p3, %p60_p0  ;;  %p97_p7 = scmp.lt.s32.totalorder %s926_s12, 3 }
   0xb   : > { %s1375_s15 = scalar_select %p985_p4, 1, 0 }
   0xc   : > { %s1376_s16 = scalar_select %p990_p6, 1, 0 }
   0xd   : > { %p995_p8 = pnand %p704_p5, %p97_p7  ;;  %s1001_s18 = sadd.s32 1, %s926_s12  }
   0xe   : > { %s44_s19 = ssub.s32 %s926_s12, %s1001_s18  ;;  %s47_s20 = sadd.s32 1, %s922_s11 }
   0xf   : > { %s1377_s17 = scalar_select %p995_p8, 1, 0 }
  0x10   : > { %p752_p10 = pneg %p995_p8  ;;  %p45_p12 = scmp.eq.s32.totalorder %s44_s19, 0 }
  0x11   : > { %p54_p13 = scmp.ne.s32.totalorder %s922_s11, %s918_s10  ;;  %p55_p0 = scmp.eq.s32.totalorder %s926_s12, 0 }
  0x12   : > { %p753_p11 = pnand %p752_p10, %p1371_p1  ;;  %p765_p3 = scmp.lt.s32.totalorder %s926_s12, 2 }
  0x13   : > { %s928_s21 = smov [#allocation2]   ;;  %p56_p5 = por %p55_p0, %p54_p13 }
  0x14   : > { %755 = dma.hbm_to_smem (!%p753_p11), %s1368_s0, 16, %s928_s21, [#allocation5]  }
  0x15   : > { %s1018_s24 = scalar_select %p45_p12, %s922_s11, %s47_s20  }
  0x16   : > { %p1022_p7 = por %p84_p2, %p54_p13  ;;  %s119_s26 = sand.u32 1, %s922_s11  }
  0x17   : > { %s742_s27 = sshll.u32 %s926_s12, 7  ;;  %s707_s28 = sshll.u32 %s119_s26, 3 }
  0x18   : > { %s1378_s25 = scalar_select %p1022_p7, 1, 0 }
  0x19   : > { %s1031_s3 = scalar_lea.hbm %s1369_s1, %s742_s27  ;;  %s123_s4 = scalar_lea.vmem [#allocation6], %s707_s28 }
  0x1a   : > { %s131_s5 = sshll.u32 %s123_s4, 4  ;;  %p1033_p10 = pnand %p765_p3, %p56_p5  ;;  %s132_s5 = int_to_ptr.vmem [resolvable:$true] %s131_s5 }
  0x1b   : > { %s120_s7 = scalar_lea.sflag [#allocation3], %s119_s26  ;;  %s830_s8 = scalar_lea.hbm %s1031_s3, 128 }
  0x1c   : > { %p831_p2 = scmp.ne.s32.totalorder %s1031_s3, %s830_s8  ;;  %p832_p11 = pneg %p1033_p10 }
  0x1d   : > { %s835_s20 = scalar_lea.hbm %s1369_s1, 256  ;;  %p836_p0 = scmp.lt.s32.totalorder %s1031_s3, %s1369_s1 }
  0x1e   : > { %p833_p12 = pnand %p832_p11, %p831_p2  ;;  %p837_p3 = scmp.lt.s32.totalorder %s835_s20, %s830_s8 }
  0x20   : > { %p834_p13 = pneg %p833_p12  ;;  %p838_p5 = por %p837_p3, %p836_p0 }
  0x22   : > { %p839_p9 = pnand %p838_p5, %p834_p13 }
  0x24   : > { %842 = shalt.err (!%p839_p9)
}
  0x25   : > { %s843_s23 = scalar_lea.vmem %s132_s5, 128  ;;  %s929_s26 = smov [#allocation6]  }
  0x26   : > { %p844_p1 = scmp.ne.s32.totalorder %s132_s5, %s843_s23  ;;  %s848_s27 = sshll.u32 %s929_s26, 4  ;;  %s849_s27 = int_to_ptr.vmem [resolvable:$false] %s848_s27 }
  0x27   : > { %s850_s28 = scalar_lea.vmem %s849_s27, 256  ;;  %p851_p2 = scmp.lt.s32.totalorder %s132_s5, %s849_s27 }
  0x28   : > { %p846_p6 = pnand %p844_p1, %p832_p11  ;;  %p852_p12 = scmp.lt.s32.totalorder %s850_s28, %s843_s23 }
  0x2a   : > { %p847_p7 = pneg %p846_p6  ;;  %p853_p4 = por %p852_p12, %p851_p2 }
  0x2c   : > { %p854_p8 = pnand %p853_p4, %p847_p7 }
  0x2e   : > { %857 = shalt.err (!%p854_p8)
}
  0x2f   : > { %759 = dma.hbm_to_vmem [thread:$0]  (!%p1033_p10), %s1031_s3, 128, %s132_s5, %s120_s7  }
  0x30   : > { %p1380_p13 = scmp.ne.s32.totalorder %s1377_s17, 0 }
  0x31   : > { %p1381_p9 = scmp.eq.s32.totalorder (!%p1380_p13), %s976_s13, 0 }
  0x32   : > { %140 = sbr.rel (%p1380_p13) target bundleno = 316 (0x13c), region = 28 }
  0x37   : > { %901 = dma.done.wait (%p1381_p9), [#allocation5], 16   ;;  %p1382_p1 = pmov %p1381_p9 }
  0x38   : > { %s1058_s29 = sand.u32 1, %s918_s10   ;;  %p1383_p4 = scmp.ne.s32.totalorder %s1375_s15, 0 }
  0x39   : > { %903 = vsyncadd (%p1382_p1), [#allocation5], 4294967280  ;;  %s712_s30 = sshll.u32 %s1058_s29, 3  ;;  %s147_s4 = scalar_lea.sflag [#allocation3], %s1058_s29 }
  0x3a   : > { %s1064_s3 = scalar_lea.vmem [#allocation6], %s712_s30 }
  0x3b   : > { %905 = dma.done.wait (%p1383_p4), %s147_s4, 128  }
  0x3c   : > { %907 = vsyncadd (%p1383_p4), %s147_s4, 4294967168 }
  0x3d   : > { %155 = sfence }
  0x3e   : > { %v172_v0 = vld [vmem:[%s1064_s3] sm:$0xff]  ;;  %vm176_vm0 = vcmask 1043456   ;;  %s930_s15 = smov 17   ;;  %s931_s17 = smov 16   ;;  %v205_v48 = vlaneseq }
  0x3f   : > { %v191_v1 = vsel %vm176_vm0, %v172_v0, -inf  ;;  %v177_v2 = vsel %vm176_vm0, %v172_v0, 0.0  ;;  %v174_v3 = vcombine.high %v172_v0, %v172_v0  ;;  %s932_s5 = smov 15   ;;  %s721_s6 = sld [smem:[#allocation2 + $0x4]] }
  0x40   : > { %v192_v4 = vrot.slane %v191_v1, 4  ;;  %v178_v5 = vrot.slane %v177_v2, 4  ;;  %s722_s7 = sld [smem:[#allocation2 + $0xd]]  ;;  %s933_s8 = smov 1   ;;  %v1094_v51 = vand.u32 127, %v205_v48 }
  0x41   : > { %v198_v6 = vsel %vm176_vm0, %v174_v3, -inf  ;;  %v184_v7 = vsel %vm176_vm0, %v174_v3, 0.0  ;;  %s934_s14 = smov 127   ;;  %s935_s19 = smov 113  }
  0x42   : > { %v193_v8 = vmax.f32 %v191_v1, %v192_v4  ;;  %v179_v9 = vadd.f32 %v178_v5, %v177_v2  ;;  %v199_v10 = vrot.slane %v198_v6, 4  ;;  %v185_v11 = vrot.slane %v184_v7, 4  ;;  %s936_s20 = smov 112   ;;  %s937_s21 = smov 111  }
  0x43   : > { %s1083_s22 = sld [smem:[#allocation2 + $0x9]]  ;;  %v1105_v54 = vadd.s32 128, %v1094_v51  ;;  %vm222_vm1 = vcmp.lt.s32.totalorder %v1094_v51, 17  ;;  %v208_v57 = vand.u32 15, %v1094_v51  ;;  %vm251_vm2 = vcmp.lt.s32.totalorder %v1094_v51, 16  ;;  %p1398_p8 = scmp.ne.s32.totalorder %s1378_s25, 0 }
  0x44   : > { %v194_v12 = vrot.slane %v193_v8, 2  ;;  %v180_v13 = vrot.slane %v179_v9, 2  ;;  %v200_v14 = vmax.f32 %v198_v6, %v199_v10  ;;  %v186_v15 = vadd.f32 %v185_v11, %v184_v7  ;;  %s1085_s23 = sld [smem:[#allocation2 + $0x1]] }
  0x45   : > { %v332_v30 = vstv %s721_s6  ;;  %s1087_s26 = sld [smem:[#allocation2 + $0xa]]  ;;  %v209_v58 = vand.u32 15, %v1105_v54  ;;  %vm210_vm3 = vcmp.ge.s32.totalorder %v1094_v51, 16  ;;  %vm278_vm4 = vcmp.lt.s32.totalorder %v1094_v51, 15 }
  0x46   : > { %v195_v16 = vmax.f32 %v193_v8, %v194_v12  ;;  %v181_v17 = vadd.f32 %v180_v13, %v179_v9  ;;  %v201_v18 = vrot.slane %v200_v14, 2  ;;  %v187_v19 = vrot.slane %v186_v15, 2  ;;  %s1089_s27 = sld [smem:[#allocation2 + $0x2]] }
  0x47   : > { %v335_v33 = vstv %s722_s7  ;;  %s1091_s28 = sld [smem:[#allocation2]]  ;;  %vm1130_vm5 = vcmp.ne.s32.totalorder %v208_v57, 0  ;;  %vm1137_vm6 = vcmp.ne.s32.totalorder %v209_v58, 0  ;;  %vm1143_vm7 = vcmp.ne.s32.totalorder %v208_v57, 15 }
  0x48   : > { %v196_v20 = vrot.slane %v195_v16, 1  ;;  %v182_v21 = vrot.slane %v181_v17, 1  ;;  %v202_v22 = vmax.f32 %v200_v14, %v201_v18  ;;  %v188_v23 = vadd.f32 %v187_v19, %v186_v15  ;;  %s1096_s4 = sld [smem:[#allocation2 + $0xb]]  ;;  %vm1200_vm11 = vmand %vm210_vm3, %vm1130_vm5 }
  0x49   : > { %v236_v59 = vstv %s1083_s22  ;;  %vm307_vm8 = vcmp.lt.s32.totalorder %v1094_v51, 1  ;;  %s1149_s6 = sld [smem:[#allocation2 + $0xe]]  ;;  %vm1155_vm9 = vcmp.ne.s32.totalorder %v209_v58, 15  ;;  %vm346_vm10 = vcmp.lt.s32.totalorder %v1094_v51, 127  ;;  %vm1218_vm13 = vmand %vm210_vm3, %vm1143_vm7  ;;  %s171_s22 = scalar_lea.vmem [#allocation7], %s712_s30 }
  0x4a   : > { %v197_v24 = vmax.f32 %v195_v16, %v196_v20  ;;  %v183_v25 = vadd.f32 %v182_v21, %v181_v17  ;;  %v203_v26 = vrot.slane %v202_v22, 1  ;;  %v189_v28 = vrot.slane %v188_v23, 1  ;;  %s1163_s7 = sld [smem:[#allocation2 + $0x6]] }
  0x4b   : > { %v262_v60 = vstv %s1085_s23  ;;  %v265_v61 = vstv %s1087_s26  ;;  %vm373_vm12 = vcmp.lt.s32.totalorder %v1094_v51, 113  ;;  %vm402_vm14 = vcmp.lt.s32.totalorder %v1094_v51, 112  ;;  %s621_s23 = sshll.u32 %s171_s22, 4  ;;  %s1327_s23 = int_to_ptr.vmem [resolvable:$true] %s621_s23 }
  0x4c   : > { %225 = vrot.lane.b32.xlu1 %v197_v24, %s930_s15  ;;  %218 = vrot.lane.b32.xlu0 %v183_v25, %s930_s15  ;;  %v204_v27 = vmax.f32 %v202_v22, %v203_v26  ;;  %v190_v29 = vadd.f32 %v189_v28, %v188_v23  ;;  %v333_v31 = vmul.f32 %v332_v30, %v183_v25  ;;  %v289_v63 = vstv %s1089_s27  ;;  %s858_s30 = scalar_lea.vmem %s1327_s23, 128 }
  0x4d   : > { %v336_v34 = vmul.f32 %v335_v33, %v197_v24  ;;  %v233_v0 = vstv %s1091_s28  ;;  %vm213_vm15 = vcmp.lt.s32.totalorder %v1105_v54, 240  ;;  %vm429_vm0 = vcmp.lt.s32.totalorder %v1094_v51, 111  ;;  %p859_p6 = scmp.ne.s32.totalorder %s1327_s23, %s858_s30 }
  0x4e   : > { %v334_v32 = vmul.f32 %v332_v30, %v190_v29  ;;  %v337_v35 = vmul.f32 %v335_v33, %v204_v27  ;;  %v292_v6 = vstv %s1096_s4  ;;  %v467_v9 = vshrl.u32 %v205_v48, 7  ;;  %s939_s4 = smov [#allocation7]  }
  0x4f   : > { %v1071_v36 = vadd.f32 %v336_v34, %v333_v31  ;;  %p860_p7 = pnand %p859_p6, %p1398_p8 }
  0x50   : > { %247 = vrot.lane.b32.xlu0 %v183_v25, %s931_s17  ;;  %227 = vrot.lane.b32.xlu1 %v204_v27, %s930_s15  ;;  %v1073_v37 = vadd.f32 %v337_v35, %v334_v32 }
  0x51   : > { %p861_p10 = pneg %p860_p7 }
  0x54   : > { %254 = vrot.lane.b32.xlu0 %v197_v24, %s931_s17  ;;  %249 = vrot.lane.b32.xlu1 %v190_v29, %s931_s17 }
  0x58   : > { %274 = vrot.lane.b32.xlu0 %v183_v25, %s932_s5  ;;  %256 = vrot.lane.b32.xlu1 %v204_v27, %s931_s17  ;;  %s1107_s17 = sld [smem:[#allocation2 + $0xc]] }
  0x5c   : > { %276 = vrot.lane.b32.xlu1 %v190_v29, %s932_s5  ;;  %220 = vrot.lane.b32.xlu0 %v190_v29, %s930_s15  ;;  %s1102_s15 = sld [smem:[#allocation2 + $0x3]] }
  0x5e   : > { %v321_v13 = vstv %s1107_s17 }
  0x60   : > { %283 = vrot.lane.b32.xlu1 %v204_v27, %s932_s5  ;;  %281 = vrot.lane.b32.xlu0 %v197_v24, %s932_s5  ;;  %s1109_s5 = sld [smem:[#allocation2 + $0x5]] }
  0x62   : > { %v318_v10 = vstv %s1102_s15  ;;  %s862_s15 = sshll.u32 %s939_s4, 4  ;;  %s863_s15 = int_to_ptr.vmem [resolvable:$false] %s862_s15 }
  0x63   : > { %s864_s17 = scalar_lea.vmem %s863_s15, 256  ;;  %p865_p11 = scmp.lt.s32.totalorder %s1327_s23, %s863_s15 }
  0x64   : > { %305 = vrot.lane.b32.xlu1 %v190_v29, %s933_s8  ;;  %303 = vrot.lane.b32.xlu0 %v183_v25, %s933_s8  ;;  %p866_p0 = scmp.lt.s32.totalorder %s864_s17, %s858_s30 }
  0x66   : > { %v357_v14 = vstv %s1109_s5  ;;  %p867_p3 = por %p866_p0, %p865_p11 }
  0x68   : > { %312 = vrot.lane.b32.xlu1 %v204_v27, %s933_s8  ;;  %310 = vrot.lane.b32.xlu0 %v197_v24, %s933_s8  ;;  %s1174_s8 = sld [smem:[#allocation2 + $0xf]]  ;;  %p868_p5 = pnand %p867_p3, %p861_p10 }
  0x6c   : > { %344 = vrot.lane.b32.xlu1 %v190_v29, %s934_s14  ;;  %342 = vrot.lane.b32.xlu0 %v183_v25, %s934_s14 }
  0x70   : > { %351 = vrot.lane.b32.xlu1 %v204_v27, %s934_s14  ;;  %349 = vrot.lane.b32.xlu0 %v197_v24, %s934_s14  ;;  %s1194_s14 = sld [smem:[#allocation2 + $0x7]] }
  0x74   : > { %371 = vrot.lane.b32.xlu1 %v190_v29, %s935_s19  ;;  %369 = vrot.lane.b32.xlu0 %v183_v25, %s935_s19 }
  0x78   : > { %378 = vrot.lane.b32.xlu1 %v204_v27, %s935_s19  ;;  %376 = vrot.lane.b32.xlu0 %v197_v24, %s935_s19  ;;  %s1209_s19 = sld [smem:[#allocation2 + $0x10]] }
  0x7c   : > { %400 = vrot.lane.b32.xlu1 %v190_v29, %s936_s20  ;;  %398 = vrot.lane.b32.xlu0 %v183_v25, %s936_s20 }
  0x80   : > { %407 = vrot.lane.b32.xlu1 %v204_v27, %s936_s20  ;;  %405 = vrot.lane.b32.xlu0 %v197_v24, %s936_s20  ;;  %s1256_s20 = sld [smem:[#allocation2 + $0x8]] }
  0x84   : > { %427 = vrot.lane.b32.xlu1 %v190_v29, %s937_s21  ;;  %425 = vrot.lane.b32.xlu0 %v183_v25, %s937_s21 }
  0x88   : > { %434 = vrot.lane.b32.xlu1 %v204_v27, %s937_s21  ;;  %432 = vrot.lane.b32.xlu0 %v197_v24, %s937_s21  ;;  %s1266_s21 = sld [smem:[#allocation2 + $0x11]] }
  0xbe   : > { %v226_v38 = vpop.permute.xlu1 %225  ;;  %v219_v39 = vpop.permute.xlu0 %218 }
  0xc2   : > { %v1075_v40 = vpop.permute.xlu0 %247  ;;  %v228_v41 = vpop.permute.xlu1 %227 }
  0xc3   : > { %v230_v62 = vsel %vm222_vm1, %v228_v41, %v226_v38  ;;  %v229_v3 = vsel %vm222_vm1, %v226_v38, %v228_v41 }
  0xc4   : > { %v237_v11 = vmul.f32 %v236_v59, %v230_v62  ;;  %v238_v15 = vmul.f32 %v236_v59, %v229_v3  ;;  %v384_v62 = vstv %s1163_s7 }
  0xc6   : > { %v255_v42 = vpop.permute.xlu0 %254  ;;  %v1077_v43 = vpop.permute.xlu1 %249 }
  0xc7   : > { %v253_v22 = vsel %vm251_vm2, %v1077_v43, %v1075_v40  ;;  %v252_v26 = vsel %vm251_vm2, %v1075_v40, %v1077_v43 }
  0xc8   : > { %v263_v34 = vmul.f32 %v262_v60, %v253_v22 }
  0xca   : > { %v1079_v44 = vpop.permute.xlu0 %274  ;;  %v257_v45 = vpop.permute.xlu1 %256 }
  0xcb   : > { %v259_v12 = vsel %vm251_vm2, %v257_v45, %v255_v42  ;;  %v258_v23 = vsel %vm251_vm2, %v255_v42, %v257_v45  ;;  %vm449_vm2 = vmand %vm213_vm15, %vm1155_vm9 }
  0xcc   : > { %v266_v27 = vmul.f32 %v265_v61, %v259_v12  ;;  %v267_v35 = vmul.f32 %v265_v61, %v258_v23 }
  0xce   : > { %v1081_v46 = vpop.permute.xlu1 %276  ;;  %v221_v47 = vpop.permute.xlu0 %220 }
  0xcf   : > { %v224_v5 = vsel %vm222_vm1, %v221_v47, %v219_v39  ;;  %v223_v8 = vsel %vm222_vm1, %v219_v39, %v221_v47  ;;  %v279_v28 = vsel %vm278_vm4, %v1079_v44, %v1081_v46  ;;  %v280_v29 = vsel %vm278_vm4, %v1081_v46, %v1079_v44  ;;  %vm1285_vm1 = vmand %vm213_vm15, %vm1137_vm6 }
  0xd0   : > { %v234_v16 = vmul.f32 %v233_v0, %v224_v5  ;;  %v235_v24 = vmul.f32 %v233_v0, %v223_v8  ;;  %v290_v42 = vmul.f32 %v289_v63, %v280_v29  ;;  %v291_v43 = vmul.f32 %v289_v63, %v279_v28 }
  0xd1   : > { %v268_v47 = vadd.f32 %v266_v27, %v263_v34  ;;  %v387_v5 = vstv %s1174_s8 }
  0xd2   : > { %v284_v49 = vpop.permute.xlu1 %283  ;;  %v282_v50 = vpop.permute.xlu0 %281  ;;  %v239_v38 = vadd.f32 %v237_v11, %v234_v16  ;;  %v240_v45 = vadd.f32 %v238_v15, %v235_v24  ;;  %v413_v16 = vstv %s1194_s14 }
  0xd3   : > { %v285_v18 = vsel %vm278_vm4, %v282_v50, %v284_v49  ;;  %v286_v19 = vsel %vm278_vm4, %v284_v49, %v282_v50 }
  0xd4   : > { %v293_v30 = vmul.f32 %v292_v6, %v286_v19  ;;  %v294_v31 = vmul.f32 %v292_v6, %v285_v18  ;;  %v243_v59 = vsel %vm1200_vm11, %v239_v38, 0.0  ;;  %v244_v3 = vsel %vm1137_vm6, %v240_v45, 0.0 }
  0xd5   : > { %v270_v6 = vsel %vm210_vm3, %v268_v47, 0.0  ;;  %vm498_vm3 = vcmp.lt.s32.totalorder %v205_v48, 256 }
  0xd6   : > { %v1098_v52 = vpop.permute.xlu1 %305  ;;  %v1100_v53 = vpop.permute.xlu0 %303  ;;  %v295_v57 = vadd.f32 %v293_v30, %v290_v42  ;;  %v296_v58 = vadd.f32 %v294_v31, %v291_v43  ;;  %v272_v12 = vadd.f32 %v270_v6, %v243_v59  ;;  %v416_v31 = vstv %s1209_s19 }
  0xd7   : > { %v309_v32 = vsel %vm307_vm8, %v1098_v52, %v1100_v53  ;;  %v308_v46 = vsel %vm307_vm8, %v1100_v53, %v1098_v52 }
  0xd8   : > { %v319_v49 = vmul.f32 %v318_v10, %v309_v32  ;;  %v320_v53 = vmul.f32 %v318_v10, %v308_v46  ;;  %v300_v15 = vsel %vm1155_vm9, %v296_v58, 0.0 }
  0xda   : > { %v313_v55 = vpop.permute.xlu1 %312  ;;  %v311_v56 = vpop.permute.xlu0 %310 }
  0xdb   : > { %v315_v25 = vsel %vm307_vm8, %v313_v55, %v311_v56  ;;  %v314_v33 = vsel %vm307_vm8, %v311_v56, %v313_v55  ;;  %v360_v55 = vstv %s1149_s6  ;;  %v264_v56 = vmul.f32 %v262_v60, %v252_v26 }
  0xdc   : > { %v322_v39 = vmul.f32 %v321_v13, %v315_v25  ;;  %v323_v50 = vmul.f32 %v321_v13, %v314_v33  ;;  %v299_v13 = vsel %vm1218_vm13, %v295_v57, 0.0 }
  0xdd   : > { %v269_v0 = vadd.f32 %v267_v35, %v264_v56  ;;  %v301_v28 = vadd.f32 %v299_v13, %v272_v12 }
  0xde   : > { %v1124_v1 = vpop.permute.xlu1 %344  ;;  %v1126_v2 = vpop.permute.xlu0 %342  ;;  %v324_v61 = vadd.f32 %v322_v39, %v319_v49  ;;  %v325_v8 = vadd.f32 %v323_v50, %v320_v53 }
  0xdf   : > { %v273_v18 = vadd.f32 %v269_v0, %v244_v3  ;;  %v440_v3 = vstv %s1256_s20 }
  0xe0   : > { %v326_v19 = vsel %vm1130_vm5, %v324_v61, 0.0  ;;  %v327_v30 = vsel %vm1137_vm6, %v325_v8, 0.0  ;;  %v443_v8 = vstv %s1266_s21 }
  0xe1   : > { %v302_v29 = vadd.f32 %v300_v15, %v273_v18  ;;  %v328_v34 = vadd.f32 %v326_v19, %v301_v28 }
  0xe2   : > { %v352_v20 = vpop.permute.xlu1 %351  ;;  %v350_v21 = vpop.permute.xlu0 %349 }
  0xe3   : > { %v353_v11 = vsel %vm346_vm10, %v350_v21, %v352_v20  ;;  %v354_v10 = vsel %vm346_vm10, %v352_v20, %v350_v21  ;;  %v347_v20 = vsel %vm346_vm10, %v1126_v2, %v1124_v1  ;;  %v348_v21 = vsel %vm346_vm10, %v1124_v1, %v1126_v2 }
  0xe4   : > { %v361_v24 = vmul.f32 %v360_v55, %v353_v11  ;;  %v362_v25 = vmul.f32 %v360_v55, %v354_v10  ;;  %v358_v1 = vmul.f32 %v357_v14, %v347_v20  ;;  %v359_v2 = vmul.f32 %v357_v14, %v348_v21 }
  0xe5   : > { %v329_v44 = vadd.f32 %v327_v30, %v302_v29 }
  0xe6   : > { %v372_v40 = vpop.permute.xlu1 %371  ;;  %v370_v41 = vpop.permute.xlu0 %369  ;;  %v363_v45 = vadd.f32 %v361_v24, %v358_v1  ;;  %v364_v46 = vadd.f32 %v362_v25, %v359_v2 }
  0xe7   : > { %v374_v32 = vsel %vm373_vm12, %v370_v41, %v372_v40  ;;  %v375_v33 = vsel %vm373_vm12, %v372_v40, %v370_v41  ;;  %v341_v0 = vadd.f32 %v1073_v37, %v329_v44  ;;  %v472_v44 = vsub.s32 1, %v467_v9 }
  0xe8   : > { %v385_v47 = vmul.f32 %v384_v62, %v374_v32  ;;  %v386_v49 = vmul.f32 %v384_v62, %v375_v33  ;;  %v365_v52 = vsel %vm1143_vm7, %v363_v45, 0.0  ;;  %v366_v53 = vsel %vm1155_vm9, %v364_v46, 0.0  ;;  %v731_v45 = vld [vmem:[%s1064_s3 + $0x1] ss:$4 sm:$0x3] }
  0xe9   : > { %v368_v10 = vadd.f32 %v366_v53, %v341_v0  ;;  %v733_v46 = vld [vmem:[%s1064_s3 + $0x2] ss:$4 sm:$0x3] }
  0xea   : > { %v379_v60 = vpop.permute.xlu1 %378  ;;  %v377_v63 = vpop.permute.xlu0 %376 }
  0xeb   : > { %v380_v26 = vsel %vm373_vm12, %v377_v63, %v379_v60  ;;  %v381_v27 = vsel %vm373_vm12, %v379_v60, %v377_v63  ;;  %v340_v63 = vadd.f32 %v1071_v36, %v328_v34 }
  0xec   : > { %v388_v35 = vmul.f32 %v387_v5, %v380_v26  ;;  %v389_v38 = vmul.f32 %v387_v5, %v381_v27 }
  0xed   : > { %v367_v11 = vadd.f32 %v365_v52, %v340_v63 }
  0xee   : > { %v401_v22 = vpop.permute.xlu1 %400  ;;  %v399_v23 = vpop.permute.xlu0 %398  ;;  %v390_v55 = vadd.f32 %v388_v35, %v385_v47  ;;  %v391_v56 = vadd.f32 %v389_v38, %v386_v49  ;;  %v464_v38 = vld [vmem:[%s1064_s3] ss:$4 sm:$0x3] }
  0xef   : > { %v404_v39 = vsel %vm402_vm14, %v401_v22, %v399_v23  ;;  %v403_v57 = vsel %vm402_vm14, %v399_v23, %v401_v22 }
  0xf0   : > { %v415_v50 = vmul.f32 %v413_v16, %v404_v39  ;;  %v414_v5 = vmul.f32 %v413_v16, %v403_v57  ;;  %v394_v12 = vsel %vm1130_vm5, %v390_v55, 0.0  ;;  %v395_v13 = vsel %vm1285_vm1, %v391_v56, 0.0 }
  0xf1   : > { %v396_v23 = vadd.f32 %v394_v12, %v367_v11  ;;  %v397_v24 = vadd.f32 %v395_v13, %v368_v10  ;;  %v938_v39 = vmov 1966171168   ;;  %v473_v55 = vrot.slane %v464_v38, %v472_v44 }
  0xf2   : > { %v408_v42 = vpop.permute.xlu1 %407  ;;  %v406_v43 = vpop.permute.xlu0 %405  ;;  %v511_v56 = vrot.slane %v731_v45, %v472_v44  ;;  %v546_v57 = vrot.slane %v733_v46, %v472_v44 }
  0xf3   : > { %v410_v14 = vsel %vm402_vm14, %v408_v42, %v406_v43  ;;  %v409_v40 = vsel %vm402_vm14, %v406_v43, %v408_v42  ;;  %v482_v42 = vunpack.c.l.s4 %v938_v39  ;;  %v468_v43 = vsub.s32 0, %v467_v9 }
  0xf4   : > { %v418_v41 = vmul.f32 %v416_v31, %v410_v14  ;;  %v417_v62 = vmul.f32 %v416_v31, %v409_v40  ;;  %v735_v14 = vld [vmem:[%s1064_s3 + $0x3] ss:$4 sm:$0x3]  ;;  %s743_s3 = sshll.u32 %s976_s13, 7  ;;  %s607_s13 = scalar_lea.sflag [#allocation4], %s1058_s29 }
  0xf5   : > { %v483_v47 = vunpack.c.0.s8 %v482_v42  ;;  %v469_v49 = vrot.slane %v464_v38, %v468_v43  ;;  %v507_v40 = vrot.slane %v731_v45, %v468_v43  ;;  %s1325_s28 = scalar_lea.hbm %s1370_s2, %s743_s3 }
  0xf6   : > { %v428_v58 = vpop.permute.xlu1 %427  ;;  %v426_v59 = vpop.permute.xlu0 %425  ;;  %v420_v60 = vadd.f32 %v418_v41, %v415_v50  ;;  %v419_v37 = vadd.f32 %v417_v62, %v414_v5  ;;  %v542_v41 = vrot.slane %v733_v46, %v468_v43  ;;  %v577_v50 = vrot.slane %v735_v14, %v468_v43 }
  0xf7   : > { %v430_v6 = vsel %vm429_vm0, %v426_v59, %v428_v58  ;;  %v431_v7 = vsel %vm429_vm0, %v428_v58, %v426_v59  ;;  %v581_v58 = vrot.slane %v735_v14, %v472_v44  ;;  %v486_v52 = vsub.s32 %v483_v47, %v467_v9 }
  0xf8   : > { %v422_v16 = vsel %vm213_vm15, %v420_v60, 0.0  ;;  %v441_v20 = vmul.f32 %v440_v3, %v430_v6  ;;  %v442_v21 = vmul.f32 %v440_v3, %v431_v7  ;;  %v423_v27 = vadd.f32 %v419_v37, %v396_v23 }
  0xf9   : > { %v424_v28 = vadd.f32 %v422_v16, %v397_v24 }
  0xfa   : > { %v435_v36 = vpop.permute.xlu1 %434  ;;  %v433_v15 = vpop.permute.xlu0 %432 }
  0xfb   : > { %v436_v18 = vsel %vm429_vm0, %v433_v15, %v435_v36  ;;  %v437_v19 = vsel %vm429_vm0, %v435_v36, %v433_v15 }
  0xfc   : > { %v444_v22 = vmul.f32 %v443_v8, %v436_v18  ;;  %v445_v4 = vmul.f32 %v443_v8, %v437_v19 }
  0xfe   : > { %v446_v25 = vadd.f32 %v444_v22, %v441_v20  ;;  %v447_v26 = vadd.f32 %v445_v4, %v442_v21 }
 0x100   : > { %v450_v29 = vsel %vm1143_vm7, %v446_v25, 0.0  ;;  %v451_v51 = vsel %vm449_vm2, %v447_v26, 0.0 }
 0x101   : > { %v452_v30 = vadd.f32 %v450_v29, %v423_v27  ;;  %v453_v31 = vadd.f32 %v451_v51, %v424_v28 }
 0x103   : > { %v454_v1 = vsub.f32 0.0, %v452_v30  ;;  %v455_v2 = vsub.f32 0.0, %v453_v31 }
 0x105   : > { %v456_v32 = vmul.f32 1.442695, %v454_v1  ;;  %v458_v33 = vmul.f32 1.442695, %v455_v2 }
 0x107   : > { %811 = vpow2.f32 %v456_v32 }
 0x108   : > { %813 = vpow2.f32 %v458_v33 }
 0x114   : > { %v812_v54 = vpop.eup %811 }
 0x115   : > { %v814_v17 = vpop.eup %813  ;;  %v460_v34 = vadd.f32 1.0, %v812_v54 }
 0x116   : > { %v461_v35 = vadd.f32 1.0, %v814_v17 }
 0x117   : > { %815 = vrcp.f32 %v460_v34 }
 0x118   : > { %817 = vrcp.f32 %v461_v35 }
 0x124   : > { %v816_v59 = vpop.eup %815 }
 0x125   : > { %v818_v53 = vpop.eup %817  ;;  %v476_v61 = vmul.f32 %v816_v59, %v469_v49  ;;  %v514_v62 = vmul.f32 %v816_v59, %v507_v40  ;;  %v549_v60 = vmul.f32 %v816_v59, %v542_v41  ;;  %v584_v63 = vmul.f32 %v816_v59, %v577_v50 }
 0x126   : > { %v477_v0 = vmul.f32 %v818_v53, %v473_v55  ;;  %v515_v3 = vmul.f32 %v818_v53, %v511_v56  ;;  %v550_v5 = vmul.f32 %v818_v53, %v546_v57  ;;  %v585_v6 = vmul.f32 %v818_v53, %v581_v58 }
 0x128   : > { %v480_v7 = vcombine.low %v476_v61, %v477_v0  ;;  %v518_v8 = vcombine.low %v514_v62, %v515_v3  ;;  %v553_v11 = vcombine.low %v549_v60, %v550_v5  ;;  %v588_v10 = vcombine.low %v584_v63, %v585_v6 }
 0x12a   : > { %v487_v12 = vrot.slane %v480_v7, %v486_v52  ;;  %v525_v13 = vrot.slane %v518_v8, %v486_v52  ;;  %v560_v36 = vrot.slane %v553_v11, %v486_v52  ;;  %v595_v15 = vrot.slane %v588_v10, %v486_v52 }
 0x12c   : > { %v494_v37 = vrot.slane %v487_v12, %v486_v52  ;;  %v532_v16 = vrot.slane %v525_v13, %v486_v52  ;;  %v567_v18 = vrot.slane %v560_v36, %v486_v52  ;;  %v602_v19 = vrot.slane %v595_v15, %v486_v52 }
 0x12e   : > { %500 = vst.msk [vmem:[%s171_s22] ss:$4 sm:$0x3] %vm498_vm3, %v494_v37  ;;  %732 = vst.msk [vmem:[%s171_s22 + $0x1] ss:$4 sm:$0x3] %vm498_vm3, %v532_v16 }
 0x12f   : > { %734 = vst.msk [vmem:[%s171_s22 + $0x2] ss:$4 sm:$0x3] %vm498_vm3, %v567_v18  ;;  %736 = vst.msk [vmem:[%s171_s22 + $0x3] ss:$4 sm:$0x3] %vm498_vm3, %v602_v19 }
 0x130   : > { %871 = shalt.err (!%p868_p5)
}
 0x131   : > { %s872_s5 = scalar_lea.hbm %s1325_s28, 128  ;;  %s876_s7 = scalar_lea.hbm %s1370_s2, 256 }
 0x132   : > { %p873_p2 = scmp.ne.s32.totalorder %s1325_s28, %s872_s5  ;;  %p877_p9 = scmp.lt.s32.totalorder %s1325_s28, %s1370_s2 }
 0x133   : > { %p878_p1 = scmp.lt.s32.totalorder %s876_s7, %s872_s5 }
 0x134   : > { %p874_p12 = pnand %p873_p2, %p1398_p8 }
 0x135   : > { %p879_p4 = por %p878_p1, %p877_p9 }
 0x136   : > { %p875_p13 = pneg %p874_p12 }
 0x138   : > { %p880_p6 = pnand %p879_p4, %p875_p13 }
 0x13a   : > { %883 = shalt.err (!%p880_p6)
}
 0x13b   : > { %750 = dma.vmem_to_hbm [thread:$0]  (%p1398_p8), %s1327_s23, 128, %s1325_s28, %s607_s13  }
 0x13c PF: > { %s633_s19 = sand.u32 1, %s914_s9   ;;  %p1399_p7 = scmp.ne.s32.totalorder %s1376_s16, 0 }
 0x13d   : > { %p1400_p10 = scmp.ge.s32.totalorder %s926_s12, 2  ;;  %s634_s20 = scalar_lea.sflag [#allocation4], %s633_s19 }
 0x13f   : > { %p761_p11 = pnand %p1400_p10, %p1399_p7 }
 0x141   : > { %p762_p0 = pneg %p761_p11 }
 0x143   : > { %909 = dma.done.wait (%p762_p0), %s634_s20, 128  }
 0x144   : > { %911 = vsyncadd (%p762_p0), %s634_s20, 4294967168  ;;  %p16_p3 = scmp.ge.s32.totalorder %s1001_s18, 4   ;;  %s1401_s9 = smov %s918_s10 }
 0x145   : > { %s1402_s10 = smov %s922_s11  ;;  %s1403_s11 = smov %s1018_s24 }
 0x146   : > { %s1404_s12 = smov %s1001_s18  ;;  %18 = sbr.rel (!%p16_p3) target bundleno = 6 (0x6), region = 84 }
 0x14b   :  { %639 = vsyncpa [#allocation3], 1 }
 0x14c   :  { %641 = vsyncpa [#allocation3 + $0x1], 1 }
 0x14d   :  { %642 = vsyncpa [#allocation4], 1 }
 0x14e   :  { %644 = vsyncpa [#allocation4 + $0x1], 1 }
 0x14f   :  { %645 = vsyncpa [#allocation5], 1 }
 0x150   :  { %647 = vsyncpa [#allocation5 + $0x1], 1 }

</bundles_post_ra>
